<compile_context>
chip_gen: v6e
topology: v6e:2x2x1
jax: 0.10.0
libtpu: 0.0.40
codegen_flags: <defaults>
</compile_context>

<pallas_src>
import math
import functools

import jax
import jax.numpy as jnp
from jax import lax
from jax.experimental import pallas as pl
from jax.experimental.pallas import tpu as pltpu


# ----------------------------- parameter setup ------------------------------

def make_positional_encoding_table(d_model: int, max_len: int = 1536,
                                   dtype=jnp.float32):
    """Deterministic sin/cos table, identical to the PyTorch __init__."""
    position = jnp.arange(max_len, dtype=jnp.float32)[:, None]          # [L,1]
    div_term = jnp.exp(jnp.arange(0, d_model, 2, dtype=jnp.float32)
                       * (-math.log(10000.0) / d_model))                # [D/2]
    pe = jnp.zeros((max_len, 1, d_model), dtype=jnp.float32)
    pe = pe.at[:, 0, 0::2].set(jnp.sin(position * div_term))
    pe = pe.at[:, 0, 1::2].set(jnp.cos(position * div_term))
    return pe.astype(dtype)


# --------------------------------- kernels ----------------------------------

def _pe_add_kernel(x_ref, pe_ref, o_ref):
    # x_ref: (TS, B, D), pe_ref: (TS, 1, D) -> broadcast over batch axis.
    o_ref[...] = (x_ref[...] + pe_ref[...]).astype(o_ref.dtype)


# splitmix/murmur-style mixing constants (0x9E3779B1, 0x85EBCA6B, 0xC2B2AE35
# written as wrapped int32 literals).
_GOLD = -1640531535
_MIX1 = -2048144789
_MIX2 = -1028477387
_MASK31 = 0x7FFFFFFF


def _hash_bits31(idx, seed):
    """Stateless per-element hash -> non-negative 31-bit uniform ints.

    Pure int32 VPU ops (mul/xor/logical-shift), so it lowers both on TPU and
    in interpret mode.
    """
    h = idx * jnp.int32(_GOLD) + seed
    h = h ^ lax.shift_right_logical(h, jnp.int32(16))
    h = h * jnp.int32(_MIX1)
    h = h ^ lax.shift_right_logical(h, jnp.int32(13))
    h = h * jnp.int32(_MIX2)
    h = h ^ lax.shift_right_logical(h, jnp.int32(16))
    return h & jnp.int32(_MASK31)


def _pe_add_dropout_kernel(seed_ref, x_ref, pe_ref, o_ref, *, keep_prob):
    # Training-mode dropout: drop with prob (1 - keep_prob), scale survivors
    # by 1/keep_prob.  Integer-threshold compare (no float-uniform construction).
    y = (x_ref[...] + pe_ref[...]).astype(jnp.float32)
    ts, B, D = y.shape

    # Global element index -> per-element random bits (deterministic under
    # "parallel" grid sharding because only position + seed enter the hash).
    r = lax.broadcasted_iota(jnp.int32, y.shape, 0) + pl.program_id(0) * ts
    b = lax.broadcasted_iota(jnp.int32, y.shape, 1)
    d = lax.broadcasted_iota(jnp.int32, y.shape, 2)
    idx = (r * B + b) * D + d
    bits = _hash_bits31(idx, seed_ref[0])

    thresh = jnp.int32(min(int(keep_prob * float(1 << 31)), _MASK31))
    keep = bits < thresh                      # P(keep) == keep_prob
    scale = jnp.float32(1.0 / keep_prob)
    o_ref[...] = jnp.where(keep, y * scale, 0.0).astype(o_ref.dtype)


# --------------------------------- wrapper -----------------------------------

def _default_tile_rows(S, B, D, itemsize,
                       vmem_budget_bytes=12 << 20,     # safe on v5e 16 MiB scoped default
                       max_dense_block_bytes=4 << 20):
    """Pick a row-tile so dense blocks are ~1-4 MiB while a conservative
    (worst-case sublane/lane padded, double-buffered) VMEM estimate stays
    under the smallest scoped-VMEM default across v5e/v6e/v7x."""
    Bp = ((B + 7) // 8) * 8          # sublane padding (worst case)
    Dp = ((D + 127) // 128) * 128    # lane padding
    # double-buffered: x block + out block (Bp sublanes each) + pe block (8 sublanes)
    per_row_vmem = 2 * itemsize * Dp * (2 * Bp + 8)
    ts = max(1, vmem_budget_bytes // per_row_vmem)
    ts = min(ts, max(1, max_dense_block_bytes // (B * D * itemsize)))
    if ts >= 8:
        ts -= ts % 8
    return max(1, min(ts, S))


def positional_encoding(x, pe, *, dropout_p: float = 0.1,
                        training: bool = False, seed: int = 0, ts: int = None):
    """x: [S, B, D]; pe: [max_len, 1, D]. Returns dropout(x + pe[:S])."""
    S, B, D = x.shape
    pe_s = pe[:S].astype(x.dtype)                  # [S, 1, D], match x dtype
    itemsize = x.dtype.itemsize

    if ts is None:
        ts = _default_tile_rows(S, B, D, itemsize)
    ts = max(1, min(ts, S))
    grid = (pl.cdiv(S, ts),)

    x_spec = pl.BlockSpec((ts, B, D), lambda i: (i, 0, 0))
    pe_spec = pl.BlockSpec((ts, 1, D), lambda i: (i, 0, 0))
    out_spec = pl.BlockSpec((ts, B, D), lambda i: (i, 0, 0))

    if (not training) or dropout_p == 0.0:
        # eval mode: dropout is identity
        return pl.pallas_call(
            _pe_add_kernel,
            out_shape=jax.ShapeDtypeStruct(x.shape, x.dtype),
            grid=grid,
            in_specs=[x_spec, pe_spec],
            out_specs=out_spec,
            compiler_params=pltpu.CompilerParams(
                dimension_semantics=("parallel",)),
        )(x, pe_s)

    # training mode: dropout fused inside the kernel
    seed_arr = jnp.array([seed], dtype=jnp.int32)
    kernel = functools.partial(_pe_add_dropout_kernel,
                               keep_prob=1.0 - dropout_p)
    gs = pltpu.PrefetchScalarGridSpec(
        num_scalar_prefetch=1,
        grid=grid,
        in_specs=[pl.BlockSpec((ts, B, D), lambda i, sref: (i, 0, 0)),
                  pl.BlockSpec((ts, 1, D), lambda i, sref: (i, 0, 0))],
        out_specs=pl.BlockSpec((ts, B, D), lambda i, sref: (i, 0, 0)),
    )
    return pl.pallas_call(
        kernel,
        out_shape=jax.ShapeDtypeStruct(x.shape, x.dtype),
        grid_spec=gs,
        compiler_params=pltpu.CompilerParams(
            dimension_semantics=("parallel",)),   # shards S-tiles across v7x cores
    )(seed_arr, x, pe_s)


# ----------------------------------- main ------------------------------------

if __name__ == "__main__":
    d_model = 128
    max_len = 1536
    seq_len = 16
    batch = 2
    dropout_p = 0.1

    key = jax.random.PRNGKey(0)
    x = jax.random.normal(key, (seq_len, batch, d_model), dtype=jnp.float32)

    pe = make_positional_encoding_table(d_model, max_len, dtype=x.dtype)

    # eval-mode forward (dropout == identity), matches the PyTorch module in
    # .eval(); check against a pure-JAX reference.
    y = positional_encoding(x, pe, dropout_p=dropout_p, training=False)
    y = jax.block_until_ready(y)

    y_ref = x + pe[:seq_len]
    assert y.shape == x.shape and y.dtype == x.dtype
    assert jnp.allclose(y, y_ref, atol=1e-6, rtol=1e-6)

    # training mode: every output element must be either 0 (dropped) or
    # (x + pe) / keep_prob (kept & rescaled).
    y_train = positional_encoding(x, pe, dropout_p=dropout_p,
                                  training=True, seed=123)
    y_train = jax.block_until_ready(y_train)
    keep_prob = 1.0 - dropout_p
    scaled = y_ref / keep_prob
    ok = jnp.isclose(y_train, scaled, atol=1e-5, rtol=1e-5) | (y_train == 0.0)
    assert bool(jnp.all(ok))

    print("KERNEL_OK")
</pallas_src>

<mosaic_0001>
module attributes {stable_mosaic.version = 11 : i64} {
  func.func @_pe_add_kernel(%arg0: i32, %arg1: memref<16x2x128xf32, #tpu.memory_space<vmem>>, %arg2: memref<16x1x128xf32, #tpu.memory_space<vmem>>, %arg3: memref<16x2x128xf32, #tpu.memory_space<vmem>>) attributes {dimension_semantics = [#tpu.dimension_semantics<parallel>], iteration_bounds = array<i64: 1>, scalar_prefetch = 0 : i64, scratch_operands = 0 : i64, tpu.core_type = #tpu.core_type<tc>, window_params = [{transform_indices = @transform_0, window_bounds = array<i64: 16, 2, 128>}, {transform_indices = @transform_1, window_bounds = array<i64: 16, 1, 128>}, {transform_indices = @transform_2, window_bounds = array<i64: 16, 2, 128>}]} {
    %c0 = arith.constant 0 : index
    %c0_0 = arith.constant 0 : index
    %c0_1 = arith.constant 0 : index
    %0 = vector.load %arg1[%c0, %c0_0, %c0_1] : memref<16x2x128xf32, #tpu.memory_space<vmem>>, vector<16x2x128xf32>
    %c0_2 = arith.constant 0 : index
    %c0_3 = arith.constant 0 : index
    %c0_4 = arith.constant 0 : index
    %1 = vector.load %arg2[%c0_2, %c0_3, %c0_4] : memref<16x1x128xf32, #tpu.memory_space<vmem>>, vector<16x1x128xf32>
    %2 = vector.broadcast %1 : vector<16x1x128xf32> to vector<16x2x128xf32>
    %3 = arith.addf %0, %2 : vector<16x2x128xf32>
    %c0_5 = arith.constant 0 : index
    %c0_6 = arith.constant 0 : index
    %c0_7 = arith.constant 0 : index
    %4 = vector.load %arg3[%c0_5, %c0_6, %c0_7] : memref<16x2x128xf32, #tpu.memory_space<vmem>>, vector<16x2x128xf32>
    tpu.vector_store %arg3[%c0_5, %c0_6, %c0_7], %3 {strides = array<i32>} : memref<16x2x128xf32, #tpu.memory_space<vmem>>, vector<16x2x128xf32>,
    return
  }
  func.func @transform_0(%arg0: i32) -> (i32, i32, i32) {
    %c0_i32 = arith.constant 0 : i32
    %c0_i32_0 = arith.constant 0 : i32
    %c0_i32_1 = arith.constant 0 : i32
    return %arg0, %c0_i32, %c0_i32_0 : i32, i32, i32
  }
  func.func @transform_1(%arg0: i32) -> (i32, i32, i32) {
    %c0_i32 = arith.constant 0 : i32
    %c0_i32_0 = arith.constant 0 : i32
    %c0_i32_1 = arith.constant 0 : i32
    return %arg0, %c0_i32, %c0_i32_0 : i32, i32, i32
  }
  func.func @transform_2(%arg0: i32) -> (i32, i32, i32) {
    %c0_i32 = arith.constant 0 : i32
    %c0_i32_0 = arith.constant 0 : i32
    %c0_i32_1 = arith.constant 0 : i32
    return %arg0, %c0_i32, %c0_i32_0 : i32, i32, i32
  }
}

</mosaic_0001>

<bundles_post_ra>
// kernel: tpu_custom_call.1
= control target key start
LH: loop header
LB: loop body
LE: loop exit
PB: predicated region body
PF: predicated region fallthrough
CT: control target
= control target key end

     0   :  { %7 = vsyncpa [#allocation3], 0  ;;  %s347_s0 = inlined_call_operand.hbm [shape: f32[16,2,128], index: 0, kind: input, shape index: {}]   ;;  %s348_s1 = inlined_call_operand.hbm [shape: f32[16,1,128], index: 1, kind: input, shape index: {}]   ;;  %s349_s2 = inlined_call_operand.hbm [shape: f32[16,2,128], index: 2, kind: output, shape index: {}]  }
   0x1   :  { %8 = vsyncpa [#allocation6], 0 }
   0x2   :  { %9 = vsyncpa [#allocation4], 0  ;;  %s307_s9 = smov [#allocation2]  }
   0x3   :  { %s15_s10 = sshll.u32 %s307_s9, 4  ;;  %s16_s10 = int_to_ptr.vmem [resolvable:$true] %s15_s10 }
   0x4   :  { %s249_s11 = scalar_lea.vmem %s16_s10, 512  ;;  %p254_p1 = scmp.lt.s32.totalorder %s16_s10, %s16_s10 }
   0x5   :  { %p250_p0 = scmp.ne.s32.totalorder %s16_s10, %s249_s11  ;;  %p255_p2 = scmp.lt.s32.totalorder %s249_s11, %s249_s11 }
   0x7   :  { %p256_p3 = por %p255_p2, %p254_p1 }
   0x9   :  { %p257_p4 = pnand %p256_p3, %p250_p0 }
   0xb   :  { %260 = shalt.err (!%p257_p4)
}
   0xc   :  { %s308_s12 = smov 32   ;;  %s309_s13 = smov 2  }
   0xd   :  { %21 = dma.hbm_to_vmem [thread:$0]  %s347_s0, 512, %s16_s10, [#allocation3], %s308_s12, %s308_s12, %s309_s13  }
   0xe   :  { %s310_s16 = smov [#allocation5]  }
   0xf   :  { %s27_s17 = sshll.u32 %s310_s16, 4  ;;  %s28_s17 = int_to_ptr.vmem [resolvable:$true] %s27_s17 }
  0x10   :  { %s269_s18 = scalar_lea.vmem %s28_s17, 256  ;;  %p274_p6 = scmp.lt.s32.totalorder %s28_s17, %s28_s17 }
  0x11   :  { %p270_p5 = scmp.ne.s32.totalorder %s28_s17, %s269_s18  ;;  %p275_p7 = scmp.lt.s32.totalorder %s269_s18, %s269_s18 }
  0x13   :  { %p276_p8 = por %p275_p7, %p274_p6 }
  0x15   :  { %p277_p9 = pnand %p276_p8, %p270_p5 }
  0x17   :  { %280 = shalt.err (!%p277_p9)
}
  0x18   :  { %s311_s19 = smov 16   ;;  %s312_s20 = smov 1  }
  0x19   :  { %33 = dma.hbm_to_vmem [thread:$0]  %s348_s1, 256, %s28_s17, [#allocation6], %s311_s19, %s311_s19, %s312_s20  }
  0x1a   :  { %301 = dma.done.wait [#allocation3], 512  }
  0x1b   :  { %302 = vsyncadd [#allocation3], 4294966784 }
  0x1c   :  { %303 = dma.done.wait [#allocation6], 256  }
  0x1d   :  { %304 = vsyncadd [#allocation6], 4294967040  ;;  %s313_s0 = smov [#allocation7]   ;;  %v40_v0 = vld [vmem:[#allocation2] sm:$0x3] }
  0x1e   :  { %s338_s23 = sshll.u32 %s313_s0, 4  ;;  %v218_v1 = vld [vmem:[#allocation5] ss:$0 sm:$0xff]  ;;  %v41_v2 = vld [vmem:[#allocation2 + $0x2] sm:$0x3]  ;;  %s206_s23 = int_to_ptr.vmem [resolvable:$true] %s338_s23 }
  0x1f   :  { %v168_v3 = vadd.f32 %v218_v1, %v40_v0  ;;  %v219_v4 = vld [vmem:[#allocation5 + $0x1] ss:$0 sm:$0xff]  ;;  %v42_v5 = vld [vmem:[#allocation2 + $0x4] sm:$0x3]  ;;  %v220_v6 = vld [vmem:[#allocation5 + $0x2] ss:$0 sm:$0xff]  ;;  %p286_p11 = scmp.lt.s32.totalorder %s206_s23, %s206_s23 }
  0x20   :  { %v169_v7 = vadd.f32 %v219_v4, %v41_v2  ;;  %v170_v8 = vadd.f32 %v220_v6, %v42_v5  ;;  %v43_v9 = vld [vmem:[#allocation2 + $0x6] sm:$0x3]  ;;  %v221_v10 = vld [vmem:[#allocation5 + $0x3] ss:$0 sm:$0xff]  ;;  %v44_v11 = vld [vmem:[#allocation2 + $0x8] sm:$0x3] }
  0x21   :  { %184 = vst [vmem:[#allocation7] sm:$0x3] %v168_v3  ;;  %v171_v12 = vadd.f32 %v221_v10, %v43_v9  ;;  %v222_v13 = vld [vmem:[#allocation5 + $0x4] ss:$0 sm:$0xff]  ;;  %v45_v14 = vld [vmem:[#allocation2 + $0xa] sm:$0x3] }
  0x22   :  { %v223_v15 = vld [vmem:[#allocation5 + $0x5] ss:$0 sm:$0xff]  ;;  %185 = vst [vmem:[#allocation7 + $0x2] sm:$0x3] %v169_v7  ;;  %186 = vst [vmem:[#allocation7 + $0x4] sm:$0x3] %v170_v8  ;;  %v172_v16 = vadd.f32 %v222_v13, %v44_v11 }
  0x23   :  { %v173_v17 = vadd.f32 %v223_v15, %v45_v14  ;;  %v46_v18 = vld [vmem:[#allocation2 + $0xc] sm:$0x3]  ;;  %v224_v19 = vld [vmem:[#allocation5 + $0x6] ss:$0 sm:$0xff]  ;;  %v47_v20 = vld [vmem:[#allocation2 + $0xe] sm:$0x3] }
  0x24   :  { %187 = vst [vmem:[#allocation7 + $0x6] sm:$0x3] %v171_v12  ;;  %v174_v21 = vadd.f32 %v224_v19, %v46_v18  ;;  %v225_v22 = vld [vmem:[#allocation5 + $0x7] ss:$0 sm:$0xff]  ;;  %v48_v23 = vld [vmem:[#allocation2 + $0x10] sm:$0x3] }
  0x25   :  { %v226_v24 = vld [vmem:[#allocation5 + $0x8] ss:$0 sm:$0xff]  ;;  %188 = vst [vmem:[#allocation7 + $0x8] sm:$0x3] %v172_v16  ;;  %189 = vst [vmem:[#allocation7 + $0xa] sm:$0x3] %v173_v17  ;;  %v175_v25 = vadd.f32 %v225_v22, %v47_v20 }
  0x26   :  { %v176_v26 = vadd.f32 %v226_v24, %v48_v23  ;;  %v49_v27 = vld [vmem:[#allocation2 + $0x12] sm:$0x3]  ;;  %v227_v28 = vld [vmem:[#allocation5 + $0x9] ss:$0 sm:$0xff]  ;;  %v50_v29 = vld [vmem:[#allocation2 + $0x14] sm:$0x3] }
  0x27   :  { %190 = vst [vmem:[#allocation7 + $0xc] sm:$0x3] %v174_v21  ;;  %v177_v30 = vadd.f32 %v227_v28, %v49_v27  ;;  %v228_v31 = vld [vmem:[#allocation5 + $0xa] ss:$0 sm:$0xff]  ;;  %v51_v32 = vld [vmem:[#allocation2 + $0x16] sm:$0x3] }
  0x28   :  { %v229_v33 = vld [vmem:[#allocation5 + $0xb] ss:$0 sm:$0xff]  ;;  %191 = vst [vmem:[#allocation7 + $0xe] sm:$0x3] %v175_v25  ;;  %192 = vst [vmem:[#allocation7 + $0x10] sm:$0x3] %v176_v26  ;;  %v178_v34 = vadd.f32 %v228_v31, %v50_v29 }
  0x29   :  { %v179_v35 = vadd.f32 %v229_v33, %v51_v32  ;;  %v52_v36 = vld [vmem:[#allocation2 + $0x18] sm:$0x3]  ;;  %v230_v37 = vld [vmem:[#allocation5 + $0xc] ss:$0 sm:$0xff]  ;;  %v53_v38 = vld [vmem:[#allocation2 + $0x1a] sm:$0x3] }
  0x2a   :  { %193 = vst [vmem:[#allocation7 + $0x12] sm:$0x3] %v177_v30  ;;  %v180_v39 = vadd.f32 %v230_v37, %v52_v36  ;;  %v231_v40 = vld [vmem:[#allocation5 + $0xd] ss:$0 sm:$0xff]  ;;  %v54_v41 = vld [vmem:[#allocation2 + $0x1c] sm:$0x3] }
  0x2b   :  { %v232_v42 = vld [vmem:[#allocation5 + $0xe] ss:$0 sm:$0xff]  ;;  %194 = vst [vmem:[#allocation7 + $0x14] sm:$0x3] %v178_v34  ;;  %195 = vst [vmem:[#allocation7 + $0x16] sm:$0x3] %v179_v35  ;;  %v181_v43 = vadd.f32 %v231_v40, %v53_v38 }
  0x2c   :  { %v182_v44 = vadd.f32 %v232_v42, %v54_v41  ;;  %v55_v45 = vld [vmem:[#allocation2 + $0x1e] sm:$0x3]  ;;  %v233_v46 = vld [vmem:[#allocation5 + $0xf] ss:$0 sm:$0xff]  ;;  %196 = vst [vmem:[#allocation7 + $0x18] sm:$0x3] %v180_v39 }
  0x2d   :  { %v183_v47 = vadd.f32 %v233_v46, %v55_v45  ;;  %197 = vst [vmem:[#allocation7 + $0x1a] sm:$0x3] %v181_v43  ;;  %s281_s1 = scalar_lea.vmem %s206_s23, 512 }
  0x2e   :  { %198 = vst [vmem:[#allocation7 + $0x1c] sm:$0x3] %v182_v44  ;;  %p282_p10 = scmp.ne.s32.totalorder %s206_s23, %s281_s1  ;;  %p287_p12 = scmp.lt.s32.totalorder %s281_s1, %s281_s1 }
  0x2f   :  { %199 = vst [vmem:[#allocation7 + $0x1e] sm:$0x3] %v183_v47 }
  0x30   :  { %p288_p13 = por %p287_p12, %p286_p11 }
  0x32   :  { %p289_p0 = pnand %p288_p13, %p282_p10 }
  0x34   :  { %292 = shalt.err (!%p289_p0)
}
  0x35   :  { %211 = dma.vmem_to_hbm [thread:$0]  %s206_s23, 512, %s349_s2, [#allocation4], %s308_s12, %s308_s12, %s309_s13  }
  0x36   :  { %305 = dma.done.wait [#allocation4], 512  }
  0x37   :  { %306 = vsyncadd [#allocation4], 4294966784 }
  0x38   :  { %215 = vsyncpa [#allocation3], 1 }
  0x39   :  { %216 = vsyncpa [#allocation6], 1 }
  0x3a   :  { %217 = vsyncpa [#allocation4], 1 }

</bundles_post_ra>
